<compile_context>
chip_gen: v7x
topology: tpu7x:2x2x1
jax: 0.10.0
libtpu: 0.0.40
codegen_flags: <defaults>
</compile_context>

<pallas_src>
import functools

import numpy as np
import jax
import jax.numpy as jnp
from jax.experimental import pallas as pl
from jax.experimental.pallas import tpu as pltpu


# ----------------------------- Pallas kernel -------------------------------
def _up_add_kernel(x_ref, y_ref, mh_ref, gw_ref, bw1_ref, b1_ref,
                   bw2_ref, b2_ref, o_ref, pad_ref):
    H2, W2C = o_ref.shape
    cdt = x_ref.dtype            # MXU input dtype (bf16 or f32)

    # Zero only the two halo rows of the persistent pad scratch.  Done every
    # grid step (2 rows -> negligible) instead of under
    # pl.when(program_id == 0): with a 'parallel' grid axis a core may never
    # execute step 0.
    zrow = jnp.zeros((1, W2C), pad_ref.dtype)
    pad_ref[0:1, :] = zrow
    pad_ref[H2 + 1:H2 + 2, :] = zrow

    # --- bilinear x2 upsample (align_corners=True), separable ---------------
    # W direction: (H, W*C) @ kron(M_w, I_C) -> (H, W2*C)
    xw = jnp.dot(x_ref[...], gw_ref[...], preferred_element_type=jnp.float32)
    # H direction: M_h @ (H, W2*C) -> (H2, W2*C)
    up = jnp.dot(mh_ref[...], xw.astype(cdt),
                 preferred_element_type=jnp.float32)

    # --- 3x3 conv + folded BN + ReLU as 3 banded matmuls --------------------
    def conv_bn_relu(act_f32, bw_ref, b_ref):
        # Store interior rows; halo rows stay zero.  Full lane width, no
        # lane offsets, no reshapes.
        pad_ref[1:H2 + 1, :] = act_f32
        acc = jnp.dot(pad_ref[0:H2, :].astype(cdt), bw_ref[0],
                      preferred_element_type=jnp.float32)
        acc = acc + jnp.dot(pad_ref[1:H2 + 1, :].astype(cdt), bw_ref[1],
                            preferred_element_type=jnp.float32)
        acc = acc + jnp.dot(pad_ref[2:H2 + 2, :].astype(cdt), bw_ref[2],
                            preferred_element_type=jnp.float32)
        # bias add + ReLU in f32 on the VPU (v5e has no bf16 VPU).
        return jnp.maximum(acc + b_ref[...], 0.0)

    h = conv_bn_relu(up, bw1_ref, b1_ref)            # conv1(upsample(x))
    h = h + y_ref[...].astype(jnp.float32)           # + y   (lane-dense add)
    o_ref[...] = conv_bn_relu(h, bw2_ref, b2_ref).astype(o_ref.dtype)  # conv2


# ------------------------------ operator setup ------------------------------
@functools.lru_cache(maxsize=None)
def _interp_matrix_1d(n_in, n_out):
    """Bilinear interpolation weights, PyTorch align_corners=True semantics."""
    if n_in == 1:
        return np.ones((n_out, 1), np.float32)
    src = np.arange(n_out, dtype=np.float64) * (n_in - 1) / (n_out - 1)
    lo = np.clip(np.floor(src).astype(np.int64), 0, n_in - 2)
    frac = src - lo
    m = np.zeros((n_out, n_in), np.float64)
    m[np.arange(n_out), lo] += 1.0 - frac
    m[np.arange(n_out), lo + 1] += frac
    return m.astype(np.float32)


def _pack_conv_banded(w_hwio, w2, c):
    """(3,3,Cin,Cout) conv weights -> (3, W2*C, W2*C) banded lane operators.

    B[dy, wp*C + ci, w*C + co] = w[dy, wp - w + 1, ci, co] for |wp - w| <= 1.
    The W zero-padding of the 'SAME' conv is folded into the clipped band.
    """
    w = np.asarray(w_hwio, np.float32)
    band = np.zeros((3, w2 * c, w2 * c), np.float32)
    for dy in range(3):
        for dx in range(3):
            for wo in range(w2):
                wp = wo + dx - 1
                if 0 <= wp < w2:
                    band[dy, wp * c:(wp + 1) * c, wo * c:(wo + 1) * c] = w[dy, dx]
    return band


def prepare_up_add(params, H, W, C, up_ratio=2, compute_dtype=jnp.bfloat16):
    """One-time host-side construction of all kernel operands (hoisted out of
    the hot path). compute_dtype is the MXU input dtype; accumulation and the
    bias/ReLU/residual epilogue are always f32."""
    H2, W2 = up_ratio * H, up_ratio * W
    mh = _interp_matrix_1d(H, H2)                                  # (H2, H)
    mw = _interp_matrix_1d(W, W2)                                  # (W2, W)
    # kron(M_w, I_C) in the (W*C) packed-lane layout: (W*C, W2*C)
    gw = np.einsum('vw,ij->wivj', mw,
                   np.eye(C, dtype=np.float32)).reshape(W * C, W2 * C)
    bw1 = _pack_conv_banded(params["w1"], W2, C)
    bw2 = _pack_conv_banded(params["w2"], W2, C)
    b1 = np.tile(np.asarray(params["b1"], np.float32).reshape(1, C), (1, W2))
    b2 = np.tile(np.asarray(params["b2"], np.float32).reshape(1, C), (1, W2))
    return {
        "up_ratio": up_ratio,
        "compute_dtype": compute_dtype,
        "mh": jnp.asarray(mh, compute_dtype),
        "gw": jnp.asarray(gw, compute_dtype),
        "bw1": jnp.asarray(bw1, compute_dtype),
        "bw2": jnp.asarray(bw2, compute_dtype),
        "b1": jnp.asarray(b1, jnp.float32),
        "b2": jnp.asarray(b2, jnp.float32),
    }


def init_params(key, c, eps=1e-5):
    """Deterministic params for conv1/conv2 with eval-mode BN folded in."""
    keys = jax.random.split(key, 12)

    def make(kw, kb, kg, kbeta, kmean, kvar):
        w = 0.1 * jax.random.normal(kw, (3, 3, c, c), jnp.float32)   # HWIO
        b = 0.1 * jax.random.normal(kb, (c,), jnp.float32)
        gamma = 1.0 + 0.1 * jax.random.normal(kg, (c,), jnp.float32)
        beta = 0.1 * jax.random.normal(kbeta, (c,), jnp.float32)
        mean = 0.1 * jax.random.normal(kmean, (c,), jnp.float32)
        var = 0.5 + jnp.abs(jax.random.normal(kvar, (c,), jnp.float32))
        scale = gamma / jnp.sqrt(var + eps)          # fold BN (eval) affine
        return w * scale, ((b - mean) * scale + beta).reshape(1, c)

    w1, b1 = make(*keys[0:6])
    w2, b2 = make(*keys[6:12])
    # TODO(synk): nn.ConvTranspose2d from __init__ is unused on the default
    # 'bilinear' forward path, so its weights are not materialized here.
    return {"w1": w1, "b1": b1, "w2": w2, "b2": b2}


# ------------------------------ forward wrapper ------------------------------
def up_add_forward(x_nchw, y_nchw, ops):
    N, C, H, W = x_nchw.shape
    r = ops["up_ratio"]
    H2, W2 = r * H, r * W
    assert y_nchw.shape == (N, C, H2, W2)
    cdt = ops["compute_dtype"]

    # NCHW -> packed (rows, W*C) lane-dense slabs (free reshapes after the
    # layout transpose).
    x2 = jnp.transpose(x_nchw, (0, 2, 3, 1)).reshape(N, H, W * C).astype(cdt)
    y2 = jnp.transpose(y_nchw, (0, 2, 3, 1)).reshape(N, H2, W2 * C).astype(cdt)

    out = pl.pallas_call(
        _up_add_kernel,
        out_shape=jax.ShapeDtypeStruct((N, H2, W2 * C), jnp.float32),
        grid_spec=pltpu.PrefetchScalarGridSpec(
            num_scalar_prefetch=0,
            grid=(N,),
            in_specs=[
                pl.BlockSpec((None, H, W * C), lambda b: (b, 0, 0)),      # x
                pl.BlockSpec((None, H2, W2 * C), lambda b: (b, 0, 0)),    # y
                pl.BlockSpec((H2, H), lambda b: (0, 0)),                  # M_h
                pl.BlockSpec((W * C, W2 * C), lambda b: (0, 0)),          # kron(M_w, I_C)
                pl.BlockSpec((3, W2 * C, W2 * C), lambda b: (0, 0, 0)),   # banded w1
                pl.BlockSpec((1, W2 * C), lambda b: (0, 0)),              # packed b1
                pl.BlockSpec((3, W2 * C, W2 * C), lambda b: (0, 0, 0)),   # banded w2
                pl.BlockSpec((1, W2 * C), lambda b: (0, 0)),              # packed b2
            ],
            out_specs=pl.BlockSpec((None, H2, W2 * C), lambda b: (b, 0, 0)),
            # H-padded activation scratch (persistent across grid steps).
            scratch_shapes=[pltpu.VMEM((H2 + 2, W2 * C), jnp.float32)],
        ),
        compiler_params=pltpu.CompilerParams(
            dimension_semantics=("parallel",)),
    )(x2, y2, ops["mh"], ops["gw"], ops["bw1"], ops["b1"], ops["bw2"], ops["b2"])

    return jnp.transpose(out.reshape(N, H2, W2, C), (0, 3, 1, 2))   # NCHW


# ----------------------------- pure-JAX reference ----------------------------
def reference_forward(x_nchw, y_nchw, params, up_ratio=2):
    N, C, H, W = x_nchw.shape
    H2, W2 = up_ratio * H, up_ratio * W
    mh = jnp.asarray(_interp_matrix_1d(H, H2))
    mw = jnp.asarray(_interp_matrix_1d(W, W2))
    xh = jnp.transpose(x_nchw, (0, 2, 3, 1))                      # NHWC
    up = jnp.einsum('vh,nhwc->nvwc', mh, xh,
                    precision=jax.lax.Precision.HIGHEST)
    up = jnp.einsum('uw,nvwc->nvuc', mw, up,
                    precision=jax.lax.Precision.HIGHEST)

    def conv(z, w, b):
        o = jax.lax.conv_general_dilated(
            z, w, (1, 1), 'SAME',
            dimension_numbers=('NHWC', 'HWIO', 'NHWC'),
            precision=jax.lax.Precision.HIGHEST)
        return jnp.maximum(o + b.reshape(1, 1, 1, -1), 0.0)

    o = conv(up, params["w1"], params["b1"])
    o = o + jnp.transpose(y_nchw, (0, 2, 3, 1))
    o = conv(o, params["w2"], params["b2"])
    return jnp.transpose(o, (0, 3, 1, 2))


# ---------------------------------- main -------------------------------------
if __name__ == "__main__":
    key = jax.random.PRNGKey(0)
    kx, ky, kp = jax.random.split(key, 3)

    N, C, H, W = 2, 4, 16, 16
    x = jax.random.normal(kx, (N, C, H, W), jnp.float32)
    y = jax.random.normal(ky, (N, C, 2 * H, 2 * W), jnp.float32)
    params = init_params(kp, C)

    ref = reference_forward(x, y, params)

    # f32 MXU-input path: tight functional check.
    ops_f32 = prepare_up_add(params, H, W, C, compute_dtype=jnp.float32)
    out_f32 = jax.block_until_ready(up_add_forward(x, y, ops_f32))
    assert out_f32.shape == (N, C, 2 * H, 2 * W)
    assert bool(jnp.allclose(out_f32, ref, atol=2e-2, rtol=2e-2))

    # bf16 MXU-input path (default perf config for v6e/v7x): f32 accumulation,
    # checked at a looser tolerance against the f32 HIGHEST reference.
    ops_bf16 = prepare_up_add(params, H, W, C, compute_dtype=jnp.bfloat16)
    out_bf16 = jax.block_until_ready(up_add_forward(x, y, ops_bf16))
    assert out_bf16.shape == (N, C, 2 * H, 2 * W)
    assert bool(jnp.allclose(out_bf16, ref, atol=1e-1, rtol=1e-1))

    print("KERNEL_OK")
</pallas_src>

<mosaic_0001>
module attributes {stable_mosaic.version = 11 : i64} {
  func.func @_up_add_kernel(%arg0: i32, %arg1: memref<1x16x64xf32, #tpu.memory_space<vmem>>, %arg2: memref<1x32x128xf32, #tpu.memory_space<vmem>>, %arg3: memref<32x16xf32, #tpu.memory_space<vmem>>, %arg4: memref<64x128xf32, #tpu.memory_space<vmem>>, %arg5: memref<3x128x128xf32, #tpu.memory_space<vmem>>, %arg6: memref<1x128xf32, #tpu.memory_space<vmem>>, %arg7: memref<3x128x128xf32, #tpu.memory_space<vmem>>, %arg8: memref<1x128xf32, #tpu.memory_space<vmem>>, %arg9: memref<1x32x128xf32, #tpu.memory_space<vmem>>, %arg10: memref<34x128xf32, #tpu.memory_space<vmem>>) attributes {dimension_semantics = [#tpu.dimension_semantics<parallel>], iteration_bounds = array<i64: 2>, scalar_prefetch = 0 : i64, scratch_operands = 1 : i64, tpu.core_type = #tpu.core_type<tc>, window_params = [{transform_indices = @transform_0, window_bounds = array<i64: 1, 16, 64>}, {transform_indices = @transform_1, window_bounds = array<i64: 1, 32, 128>}, {pipeline_mode = #tpu.pipeline_mode<synchronous>, transform_indices = @transform_2, window_bounds = array<i64: 32, 16>}, {pipeline_mode = #tpu.pipeline_mode<synchronous>, transform_indices = @transform_3, window_bounds = array<i64: 64, 128>}, {pipeline_mode = #tpu.pipeline_mode<synchronous>, transform_indices = @transform_4, window_bounds = array<i64: 3, 128, 128>}, {pipeline_mode = #tpu.pipeline_mode<synchronous>, transform_indices = @transform_5, window_bounds = array<i64: 1, 128>}, {pipeline_mode = #tpu.pipeline_mode<synchronous>, transform_indices = @transform_6, window_bounds = array<i64: 3, 128, 128>}, {pipeline_mode = #tpu.pipeline_mode<synchronous>, transform_indices = @transform_7, window_bounds = array<i64: 1, 128>}, {transform_indices = @transform_8, window_bounds = array<i64: 1, 32, 128>}]} {
    %cst = arith.constant 0.000000e+00 : f32
    %0 = vector.broadcast %cst : f32 to vector<1x128xf32>
    %c0 = arith.constant 0 : index
    %c0_0 = arith.constant 0 : index
    %1 = vector.load %arg10[%c0, %c0_0] : memref<34x128xf32, #tpu.memory_space<vmem>>, vector<1x128xf32>
    tpu.vector_store %arg10[%c0, %c0_0], %0 {strides = array<i32>} : memref<34x128xf32, #tpu.memory_space<vmem>>, vector<1x128xf32>,
    %c33 = arith.constant 33 : index
    %c0_1 = arith.constant 0 : index
    %2 = vector.load %arg10[%c33, %c0_1] : memref<34x128xf32, #tpu.memory_space<vmem>>, vector<1x128xf32>
    tpu.vector_store %arg10[%c33, %c0_1], %0 {strides = array<i32>} : memref<34x128xf32, #tpu.memory_space<vmem>>, vector<1x128xf32>,
    %c0_2 = arith.constant 0 : index
    %c0_3 = arith.constant 0 : index
    %c0_4 = arith.constant 0 : index
    %3 = vector.load %arg1[%c0_2, %c0_3, %c0_4] : memref<1x16x64xf32, #tpu.memory_space<vmem>>, vector<1x16x64xf32>
    %4 = vector.shape_cast %3 : vector<1x16x64xf32> to vector<16x64xf32>
    %c0_5 = arith.constant 0 : index
    %c0_6 = arith.constant 0 : index
    %5 = vector.load %arg4[%c0_5, %c0_6] : memref<64x128xf32, #tpu.memory_space<vmem>>, vector<64x128xf32>
    %cst_7 = arith.constant dense<0.000000e+00> : vector<16x128xf32>
    %6 = tpu.matmul %4, %5, %cst_7 {dimension_numbers = #tpu.dot_dimension_numbers<[1], [0], [0], [1], [0, 0, 1, 1], [], []>} : vector<16x64xf32>, vector<64x128xf32>, vector<16x128xf32> -> vector<16x128xf32>
    %c0_8 = arith.constant 0 : index
    %c0_9 = arith.constant 0 : index
    %7 = vector.load %arg3[%c0_8, %c0_9] : memref<32x16xf32, #tpu.memory_space<vmem>>, vector<32x16xf32>
    %cst_10 = arith.constant dense<0.000000e+00> : vector<32x128xf32>
    %8 = tpu.matmul %7, %6, %cst_10 {dimension_numbers = #tpu.dot_dimension_numbers<[1], [0], [0], [1], [0, 0, 1, 1], [], []>} : vector<32x16xf32>, vector<16x128xf32>, vector<32x128xf32> -> vector<32x128xf32>
    %c1 = arith.constant 1 : index
    %c0_11 = arith.constant 0 : index
    %9 = vector.load %arg10[%c1, %c0_11] : memref<34x128xf32, #tpu.memory_space<vmem>>, vector<32x128xf32>
    tpu.vector_store %arg10[%c1, %c0_11], %8 {strides = array<i32>} : memref<34x128xf32, #tpu.memory_space<vmem>>, vector<32x128xf32>,
    %c0_12 = arith.constant 0 : index
    %c0_13 = arith.constant 0 : index
    %10 = vector.load %arg10[%c0_12, %c0_13] : memref<34x128xf32, #tpu.memory_space<vmem>>, vector<32x128xf32>
    %c0_14 = arith.constant 0 : index
    %c0_15 = arith.constant 0 : index
    %c0_16 = arith.constant 0 : index
    %11 = vector.load %arg5[%c0_14, %c0_15, %c0_16] : memref<3x128x128xf32, #tpu.memory_space<vmem>>, vector<1x128x128xf32>
    %12 = vector.shape_cast %11 : vector<1x128x128xf32> to vector<128x128xf32>
    %cst_17 = arith.constant dense<0.000000e+00> : vector<32x128xf32>
    %13 = tpu.matmul %10, %12, %cst_17 {dimension_numbers = #tpu.dot_dimension_numbers<[1], [0], [0], [1], [0, 0, 1, 1], [], []>} : vector<32x128xf32>, vector<128x128xf32>, vector<32x128xf32> -> vector<32x128xf32>
    %c1_18 = arith.constant 1 : index
    %c0_19 = arith.constant 0 : index
    %14 = vector.load %arg10[%c1_18, %c0_19] : memref<34x128xf32, #tpu.memory_space<vmem>>, vector<32x128xf32>
    %c1_20 = arith.constant 1 : index
    %c0_21 = arith.constant 0 : index
    %c0_22 = arith.constant 0 : index
    %15 = vector.load %arg5[%c1_20, %c0_21, %c0_22] : memref<3x128x128xf32, #tpu.memory_space<vmem>>, vector<1x128x128xf32>
    %16 = vector.shape_cast %15 : vector<1x128x128xf32> to vector<128x128xf32>
    %cst_23 = arith.constant dense<0.000000e+00> : vector<32x128xf32>
    %17 = tpu.matmul %14, %16, %cst_23 {dimension_numbers = #tpu.dot_dimension_numbers<[1], [0], [0], [1], [0, 0, 1, 1], [], []>} : vector<32x128xf32>, vector<128x128xf32>, vector<32x128xf32> -> vector<32x128xf32>
    %18 = arith.addf %13, %17 : vector<32x128xf32>
    %c2 = arith.constant 2 : index
    %c0_24 = arith.constant 0 : index
    %19 = vector.load %arg10[%c2, %c0_24] : memref<34x128xf32, #tpu.memory_space<vmem>>, vector<32x128xf32>
    %c2_25 = arith.constant 2 : index
    %c0_26 = arith.constant 0 : index
    %c0_27 = arith.constant 0 : index
    %20 = vector.load %arg5[%c2_25, %c0_26, %c0_27] : memref<3x128x128xf32, #tpu.memory_space<vmem>>, vector<1x128x128xf32>
    %21 = vector.shape_cast %20 : vector<1x128x128xf32> to vector<128x128xf32>
    %cst_28 = arith.constant dense<0.000000e+00> : vector<32x128xf32>
    %22 = tpu.matmul %19, %21, %cst_28 {dimension_numbers = #tpu.dot_dimension_numbers<[1], [0], [0], [1], [0, 0, 1, 1], [], []>} : vector<32x128xf32>, vector<128x128xf32>, vector<32x128xf32> -> vector<32x128xf32>
    %23 = arith.addf %18, %22 : vector<32x128xf32>
    %c0_29 = arith.constant 0 : index
    %c0_30 = arith.constant 0 : index
    %24 = vector.load %arg6[%c0_29, %c0_30] : memref<1x128xf32, #tpu.memory_space<vmem>>, vector<1x128xf32>
    %25 = vector.broadcast %24 : vector<1x128xf32> to vector<32x128xf32>
    %26 = arith.addf %23, %25 : vector<32x128xf32>
    %cst_31 = arith.constant 0.000000e+00 : f32
    %27 = vector.broadcast %cst_31 : f32 to vector<32x128xf32>
    %28 = arith.maximumf %26, %27 : vector<32x128xf32>
    %c0_32 = arith.constant 0 : index
    %c0_33 = arith.constant 0 : index
    %c0_34 = arith.constant 0 : index
    %29 = vector.load %arg2[%c0_32, %c0_33, %c0_34] : memref<1x32x128xf32, #tpu.memory_space<vmem>>, vector<1x32x128xf32>
    %30 = vector.shape_cast %29 : vector<1x32x128xf32> to vector<32x128xf32>
    %31 = arith.addf %28, %30 : vector<32x128xf32>
    %c1_35 = arith.constant 1 : index
    %c0_36 = arith.constant 0 : index
    %32 = vector.load %arg10[%c1_35, %c0_36] : memref<34x128xf32, #tpu.memory_space<vmem>>, vector<32x128xf32>
    tpu.vector_store %arg10[%c1_35, %c0_36], %31 {strides = array<i32>} : memref<34x128xf32, #tpu.memory_space<vmem>>, vector<32x128xf32>,
    %c0_37 = arith.constant 0 : index
    %c0_38 = arith.constant 0 : index
    %33 = vector.load %arg10[%c0_37, %c0_38] : memref<34x128xf32, #tpu.memory_space<vmem>>, vector<32x128xf32>
    %c0_39 = arith.constant 0 : index
    %c0_40 = arith.constant 0 : index
    %c0_41 = arith.constant 0 : index
    %34 = vector.load %arg7[%c0_39, %c0_40, %c0_41] : memref<3x128x128xf32, #tpu.memory_space<vmem>>, vector<1x128x128xf32>
    %35 = vector.shape_cast %34 : vector<1x128x128xf32> to vector<128x128xf32>
    %cst_42 = arith.constant dense<0.000000e+00> : vector<32x128xf32>
    %36 = tpu.matmul %33, %35, %cst_42 {dimension_numbers = #tpu.dot_dimension_numbers<[1], [0], [0], [1], [0, 0, 1, 1], [], []>} : vector<32x128xf32>, vector<128x128xf32>, vector<32x128xf32> -> vector<32x128xf32>
    %c1_43 = arith.constant 1 : index
    %c0_44 = arith.constant 0 : index
    %37 = vector.load %arg10[%c1_43, %c0_44] : memref<34x128xf32, #tpu.memory_space<vmem>>, vector<32x128xf32>
    %c1_45 = arith.constant 1 : index
    %c0_46 = arith.constant 0 : index
    %c0_47 = arith.constant 0 : index
    %38 = vector.load %arg7[%c1_45, %c0_46, %c0_47] : memref<3x128x128xf32, #tpu.memory_space<vmem>>, vector<1x128x128xf32>
    %39 = vector.shape_cast %38 : vector<1x128x128xf32> to vector<128x128xf32>
    %cst_48 = arith.constant dense<0.000000e+00> : vector<32x128xf32>
    %40 = tpu.matmul %37, %39, %cst_48 {dimension_numbers = #tpu.dot_dimension_numbers<[1], [0], [0], [1], [0, 0, 1, 1], [], []>} : vector<32x128xf32>, vector<128x128xf32>, vector<32x128xf32> -> vector<32x128xf32>
    %41 = arith.addf %36, %40 : vector<32x128xf32>
    %c2_49 = arith.constant 2 : index
    %c0_50 = arith.constant 0 : index
    %42 = vector.load %arg10[%c2_49, %c0_50] : memref<34x128xf32, #tpu.memory_space<vmem>>, vector<32x128xf32>
    %c2_51 = arith.constant 2 : index
    %c0_52 = arith.constant 0 : index
    %c0_53 = arith.constant 0 : index
    %43 = vector.load %arg7[%c2_51, %c0_52, %c0_53] : memref<3x128x128xf32, #tpu.memory_space<vmem>>, vector<1x128x128xf32>
    %44 = vector.shape_cast %43 : vector<1x128x128xf32> to vector<128x128xf32>
    %cst_54 = arith.constant dense<0.000000e+00> : vector<32x128xf32>
    %45 = tpu.matmul %42, %44, %cst_54 {dimension_numbers = #tpu.dot_dimension_numbers<[1], [0], [0], [1], [0, 0, 1, 1], [], []>} : vector<32x128xf32>, vector<128x128xf32>, vector<32x128xf32> -> vector<32x128xf32>
    %46 = arith.addf %41, %45 : vector<32x128xf32>
    %c0_55 = arith.constant 0 : index
    %c0_56 = arith.constant 0 : index
    %47 = vector.load %arg8[%c0_55, %c0_56] : memref<1x128xf32, #tpu.memory_space<vmem>>, vector<1x128xf32>
    %48 = vector.broadcast %47 : vector<1x128xf32> to vector<32x128xf32>
    %49 = arith.addf %46, %48 : vector<32x128xf32>
    %cst_57 = arith.constant 0.000000e+00 : f32
    %50 = vector.broadcast %cst_57 : f32 to vector<32x128xf32>
    %51 = arith.maximumf %49, %50 : vector<32x128xf32>
    %c0_58 = arith.constant 0 : index
    %c0_59 = arith.constant 0 : index
    %c0_60 = arith.constant 0 : index
    %52 = vector.load %arg9[%c0_58, %c0_59, %c0_60] : memref<1x32x128xf32, #tpu.memory_space<vmem>>, vector<1x32x128xf32>
    %53 = vector.shape_cast %52 : vector<1x32x128xf32> to vector<32x128xf32>
    %54 = vector.shape_cast %51 : vector<32x128xf32> to vector<1x32x128xf32>
    tpu.vector_store %arg9[%c0_58, %c0_59, %c0_60], %54 {strides = array<i32>} : memref<1x32x128xf32, #tpu.memory_space<vmem>>, vector<1x32x128xf32>,
    return
  }
  func.func @transform_0(%arg0: i32) -> (i32, i32, i32) {
    %c0_i32 = arith.constant 0 : i32
    %c0_i32_0 = arith.constant 0 : i32
    %c0_i32_1 = arith.constant 0 : i32
    return %arg0, %c0_i32, %c0_i32_0 : i32, i32, i32
  }
  func.func @transform_1(%arg0: i32) -> (i32, i32, i32) {
    %c0_i32 = arith.constant 0 : i32
    %c0_i32_0 = arith.constant 0 : i32
    %c0_i32_1 = arith.constant 0 : i32
    return %arg0, %c0_i32, %c0_i32_0 : i32, i32, i32
  }
  func.func @transform_2(%arg0: i32) -> (i32, i32) {
    %c0_i32 = arith.constant 0 : i32
    %c0_i32_0 = arith.constant 0 : i32
    %c0_i32_1 = arith.constant 0 : i32
    return %c0_i32, %c0_i32_0 : i32, i32
  }
  func.func @transform_3(%arg0: i32) -> (i32, i32) {
    %c0_i32 = arith.constant 0 : i32
    %c0_i32_0 = arith.constant 0 : i32
    %c0_i32_1 = arith.constant 0 : i32
    return %c0_i32, %c0_i32_0 : i32, i32
  }
  func.func @transform_4(%arg0: i32) -> (i32, i32, i32) {
    %c0_i32 = arith.constant 0 : i32
    %c0_i32_0 = arith.constant 0 : i32
    %c0_i32_1 = arith.constant 0 : i32
    %c0_i32_2 = arith.constant 0 : i32
    return %c0_i32, %c0_i32_0, %c0_i32_1 : i32, i32, i32
  }
  func.func @transform_5(%arg0: i32) -> (i32, i32) {
    %c0_i32 = arith.constant 0 : i32
    %c0_i32_0 = arith.constant 0 : i32
    %c0_i32_1 = arith.constant 0 : i32
    return %c0_i32, %c0_i32_0 : i32, i32
  }
  func.func @transform_6(%arg0: i32) -> (i32, i32, i32) {
    %c0_i32 = arith.constant 0 : i32
    %c0_i32_0 = arith.constant 0 : i32
    %c0_i32_1 = arith.constant 0 : i32
    %c0_i32_2 = arith.constant 0 : i32
    return %c0_i32, %c0_i32_0, %c0_i32_1 : i32, i32, i32
  }
  func.func @transform_7(%arg0: i32) -> (i32, i32) {
    %c0_i32 = arith.constant 0 : i32
    %c0_i32_0 = arith.constant 0 : i32
    %c0_i32_1 = arith.constant 0 : i32
    return %c0_i32, %c0_i32_0 : i32, i32
  }
  func.func @transform_8(%arg0: i32) -> (i32, i32, i32) {
    %c0_i32 = arith.constant 0 : i32
    %c0_i32_0 = arith.constant 0 : i32
    %c0_i32_1 = arith.constant 0 : i32
    return %arg0, %c0_i32, %c0_i32_0 : i32, i32, i32
  }
}

</mosaic_0001>

<bundles_post_ra>
// kernel: tpu_custom_call.1
= control target key start
LH: loop header
LB: loop body
LE: loop exit
PB: predicated region body
PF: predicated region fallthrough
CT: control target
= control target key end

     0   :  { %13 = vsyncpa [#allocation4], 0  ;;  %s2695_s0 = inlined_call_operand.vmem [shape: f32[2,16,64], index: 0, kind: input, shape index: {}]   ;;  %s2696_s1 = inlined_call_operand.hbm [shape: f32[2,32,128], index: 1, kind: input, shape index: {}]   ;;  %s2697_s2 = inlined_call_operand.vmem [shape: f32[32,16], index: 2, kind: input, shape index: {}]   ;;  %s2698_s3 = inlined_call_operand.hbm [shape: f32[64,128], index: 3, kind: input, shape index: {}]   ;;  %s2699_s4 = inlined_call_operand.hbm [shape: f32[3,128,128], index: 4, kind: input, shape index: {}]   ;;  %s2700_s5 = inlined_call_operand.vmem [shape: f32[1,128], index: 5, kind: input, shape index: {}]   ;;  %s2701_s6 = inlined_call_operand.hbm [shape: f32[3,128,128], index: 6, kind: input, shape index: {}]   ;;  %s2702_s7 = inlined_call_operand.vmem [shape: f32[1,128], index: 7, kind: input, shape index: {}]   ;;  %s2703_s8 = inlined_call_operand.hbm [shape: f32[2,32,128], index: 8, kind: output, shape index: {}]  }
   0x1   :  { %15 = vsyncpa [#allocation4 + $0x1], 0 }
   0x2   :  { %16 = vsyncpa [#allocation7], 0 }
   0x3   :  { %17 = vsyncpa [#allocation10], 0 }
   0x4   :  { %18 = vsyncpa [#allocation5], 0 }
   0x5   :  { %20 = vsyncpa [#allocation5 + $0x1], 0  ;;  %s2385_s27 = smov 0   ;;  %s2387_s28 = smov 0  }
   0x6   :  { %s2389_s29 = smov 0   ;;  %s2391_s30 = smov 0  }
   0x7 LB: > { %2709 = sst [smem:[#allocation16_spill]] %s2316_s27  ;;  %s2406_s9 = sadd.s32 4294967295, %s2328_s30   ;;  %s2328_s30 = sphi %s2391_s30, %s2732_s30   ;;  %s2324_s29 = sphi %s2389_s29, %s2731_s29   ;;  %s2320_s28 = sphi %s2387_s28, %s2730_s28   ;;  %s2316_s27 = sphi %s2385_s27, %s2729_s27  }
   0x8   : > { %s1404_s10 = sadd.s32 4294967294, %s2328_s30   ;;  %p72_p0 = scmp.ne.s32.totalorder %s2320_s28, %s2316_s27 }
   0x9   : > { %p2704_p1 = scmp.eq.s32.totalorder %s2406_s9, 0  ;;  %p228_p3 = scmp.eq.s32.totalorder %s1404_s10, 1 }
   0xa   : > { %p1405_p5 = scmp.ge.s32.totalorder %s2328_s30, 1  ;;  %p235_p7 = scmp.lt.s32.totalorder %s2328_s30, 3 }
   0xb   : > { %p2415_p4 = por %p2704_p1, %p72_p0  ;;  %p2420_p6 = por %p228_p3, %p72_p0 }
   0xc   : > { %p2425_p8 = pnand %p1405_p5, %p235_p7  ;;  %s2330_s14 = smov [#allocation6]  }
   0xd   : > { %s2710_s11 = scalar_select %p2415_p4, 1, 0 }
   0xe   : > { %s2711_s12 = scalar_select %p2420_p6, 1, 0 }
   0xf   : > { %s2713_s13 = scalar_select %p2425_p8, 1, 0 }
  0x10   : > { %2712 = sst [smem:[#allocation17_spill]] %s2711_s12  ;;  %s250_s15 = sshll.u32 %s2330_s14, 4  ;;  %s2429_s15 = int_to_ptr.vmem [resolvable:$true] %s250_s15 }
  0x11   : > { %p2074_p9 = pneg %p2425_p8  ;;  %s2331_s17 = smov [#allocation8]  }
  0x12   : > { %s263_s18 = sshll.u32 %s2331_s17, 4  ;;  %s2332_s19 = smov [#allocation9]   ;;  %s2440_s18 = int_to_ptr.vmem [resolvable:$true] %s263_s18 }
  0x13   : > { %p2436_p11 = pnand %p2074_p9, %p2704_p1  ;;  %s2442_s20 = sshll.u32 %s2332_s19, 4  ;;  %s280_s20 = int_to_ptr.vmem [resolvable:$true] %s2442_s20 }
  0x14   : > { %s2140_s23 = scalar_lea.hbm %s2698_s3, 1024 }
  0x15   : > { %p2141_p12 = scmp.ne.s32.totalorder %s2698_s3, %s2140_s23  ;;  %p2452_p13 = pneg %p2436_p11 }
  0x16   : > { %p2147_p5 = scmp.lt.u32.totalorder %s2140_s23, %s2698_s3 }
  0x17   : > { %p2143_p0 = pnand %p2452_p13, %p2141_p12 }
  0x19   : > { %p2144_p3 = pneg %p2143_p0 }
  0x1b   : > { %p2149_p7 = pnand %p2147_p5, %p2144_p3 }
  0x1d   : > { %2152 = shalt.err (!%p2149_p7)
}
  0x1e   : > { %s2153_s17 = scalar_lea.vmem %s2429_s15, 1024  ;;  %p2161_p2 = scmp.lt.s32.totalorder %s2429_s15, %s2429_s15 }
  0x1f   : > { %p2154_p9 = scmp.ne.s32.totalorder %s2429_s15, %s2153_s17  ;;  %p2162_p6 = scmp.lt.s32.totalorder %s2153_s17, %s2153_s17 }
  0x21   : > { %p2156_p10 = pnand %p2154_p9, %p2452_p13  ;;  %p2163_p12 = por %p2162_p6, %p2161_p2 }
  0x23   : > { %p2157_p1 = pneg %p2156_p10 }
  0x25   : > { %p2164_p0 = pnand %p2163_p12, %p2157_p1 }
  0x27   : > { %2167 = shalt.err (!%p2164_p0)
}
  0x28   : > { %s2333_s19 = smov 128   ;;  %s2334_s21 = smov 8  }
  0x29   : > { %2077 = dma.hbm_to_vmem [thread:$0]  (!%p2436_p11), %s2698_s3, 1024, %s2429_s15, [#allocation7], %s2333_s19, %s2333_s19, %s2334_s21  }
  0x2a   : > { %s2168_s10 = scalar_lea.hbm %s2699_s4, 6144 }
  0x2b   : > { %p2169_p1 = scmp.ne.s32.totalorder %s2699_s4, %s2168_s10  ;;  %p2175_p10 = scmp.lt.u32.totalorder %s2168_s10, %s2699_s4 }
  0x2d   : > { %p2171_p2 = pnand %p2169_p1, %p2452_p13 }
  0x2f   : > { %p2172_p6 = pneg %p2171_p2 }
  0x31   : > { %p2177_p3 = pnand %p2175_p10, %p2172_p6 }
  0x33   : > { %2180 = shalt.err (!%p2177_p3)
}
  0x34   : > { %s2181_s15 = scalar_lea.vmem %s2440_s18, 6144  ;;  %p2189_p12 = scmp.lt.s32.totalorder %s2440_s18, %s2440_s18 }
  0x35   : > { %p2182_p5 = scmp.ne.s32.totalorder %s2440_s18, %s2181_s15  ;;  %p2190_p0 = scmp.lt.s32.totalorder %s2181_s15, %s2181_s15 }
  0x37   : > { %p2184_p7 = pnand %p2182_p5, %p2452_p13  ;;  %p2191_p1 = por %p2190_p0, %p2189_p12 }
  0x39   : > { %p2185_p9 = pneg %p2184_p7 }
  0x3b   : > { %p2192_p2 = pnand %p2191_p1, %p2185_p9 }
  0x3d   : > { %2195 = shalt.err (!%p2192_p2)
}
  0x3e   : > { %2080 = dma.hbm_to_vmem [thread:$0]  (!%p2436_p11), %s2699_s4, 6144, %s2440_s18, [#allocation7], %s2333_s19, %s2333_s19, %s2334_s21  }
  0x3f   : > { %s2196_s24 = scalar_lea.hbm %s2701_s6, 6144 }
  0x40   : > { %p2197_p6 = scmp.ne.s32.totalorder %s2701_s6, %s2196_s24  ;;  %p2203_p5 = scmp.lt.u32.totalorder %s2196_s24, %s2701_s6 }
  0x42   : > { %p2199_p10 = pnand %p2197_p6, %p2452_p13 }
  0x44   : > { %p2200_p3 = pneg %p2199_p10 }
  0x46   : > { %p2205_p7 = pnand %p2203_p5, %p2200_p3 }
  0x48   : > { %2208 = shalt.err (!%p2205_p7)
}
  0x49   : > { %s2209_s15 = scalar_lea.vmem %s280_s20, 6144  ;;  %p2217_p1 = scmp.lt.s32.totalorder %s280_s20, %s280_s20 }
  0x4a   : > { %p2210_p9 = scmp.ne.s32.totalorder %s280_s20, %s2209_s15  ;;  %p2218_p2 = scmp.lt.s32.totalorder %s2209_s15, %s2209_s15 }
  0x4c   : > { %p2212_p12 = pnand %p2210_p9, %p2452_p13  ;;  %p2219_p4 = por %p2218_p2, %p2217_p1 }
  0x4e   : > { %p2213_p0 = pneg %p2212_p12 }
  0x50   : > { %p2220_p8 = pnand %p2219_p4, %p2213_p0 }
  0x52   : > { %2223 = shalt.err (!%p2220_p8)
}
  0x53   : > { %2083 = dma.hbm_to_vmem [thread:$0]  (!%p2436_p11), %s2701_s6, 6144, %s280_s20, [#allocation10], %s2333_s19, %s2333_s19, %s2334_s21  }
  0x54   : > { %s2525_s26 = sadd.s32 1, %s2328_s30   ;;  %s59_s12 = sadd.s32 1, %s2324_s29 }
  0x55   : > { %s56_s16 = ssub.s32 %s2328_s30, %s2525_s26  ;;  %p66_p8 = scmp.ne.s32.totalorder %s2324_s29, %s2320_s28 }
  0x56   : > { %p57_p4 = scmp.eq.s32.totalorder %s56_s16, 0  ;;  %p67_p13 = scmp.eq.s32.totalorder %s2328_s30, 0 }
  0x57   : > { %p2095_p6 = scmp.lt.s32.totalorder %s2328_s30, 2  ;;  %p2716_p3 = scmp.eq.s32.totalorder %s2406_s9, 1 }
  0x58   : > { %s2535_s22 = scalar_select %p57_p4, %s2324_s29, %s59_s12  }
  0x59   : > { %p68_p10 = por %p67_p13, %p66_p8  ;;  %p2539_p5 = por %p2716_p3, %p66_p8 }
  0x5a   : > { %s304_s24 = sand.u32 1, %s2324_s29   ;;  %s1434_s25 = sshll.u32 %s2328_s30, 9 }
  0x5b   : > { %s1410_s20 = sshll.u32 %s304_s24, 5  ;;  %s2548_s17 = scalar_lea.hbm %s2696_s1, %s1434_s25 }
  0x5c   : > { %s308_s15 = scalar_lea.vmem [#allocation3], %s1410_s20  ;;  %p2550_p11 = pnand %p2095_p6, %p68_p10 }
  0x5d   : > { %s315_s18 = sshll.u32 %s308_s15, 4  ;;  %s2556_s16 = scalar_lea.sflag [#allocation4], %s304_s24  ;;  %s2554_s18 = int_to_ptr.vmem [resolvable:$true] %s315_s18 }
  0x5e   : > { %s2224_s12 = scalar_lea.hbm %s2548_s17, 512  ;;  %p2226_p9 = pneg %p2550_p11 }
  0x5f   : > { %p2225_p7 = scmp.ne.s32.totalorder %s2548_s17, %s2224_s12  ;;  %s2229_s10 = scalar_lea.hbm %s2696_s1, 1024 }
  0x60   : > { %p2230_p1 = scmp.lt.u32.totalorder %s2548_s17, %s2696_s1  ;;  %p2231_p2 = scmp.lt.u32.totalorder %s2229_s10, %s2224_s12 }
  0x61   : > { %p2227_p12 = pnand %p2226_p9, %p2225_p7  ;;  %p2233_p8 = scmp.lt.u32.totalorder %s2224_s12, %s2548_s17 }
  0x62   : > { %p2232_p4 = por %p2231_p2, %p2230_p1 }
  0x63   : > { %p2228_p0 = pneg %p2227_p12 }
  0x64   : > { %p2234_p13 = por %p2233_p8, %p2232_p4 }
  0x66   : > { %p2235_p6 = pnand %p2234_p13, %p2228_p0 }
  0x68   : > { %2238 = shalt.err (!%p2235_p6)
}
  0x69   : > { %s2239_s24 = scalar_lea.vmem %s2554_s18, 512  ;;  %s2335_s25 = smov [#allocation3]  }
  0x6a   : > { %p2240_p10 = scmp.ne.s32.totalorder %s2554_s18, %s2239_s24  ;;  %s2244_s20 = sshll.u32 %s2335_s25, 4  ;;  %s2245_s20 = int_to_ptr.vmem [resolvable:$false] %s2244_s20 }
  0x6b   : > { %s2246_s14 = scalar_lea.vmem %s2245_s20, 1024  ;;  %p2247_p12 = scmp.lt.s32.totalorder %s2554_s18, %s2245_s20 }
  0x6c   : > { %p2242_p3 = pnand %p2240_p10, %p2226_p9  ;;  %p2248_p1 = scmp.lt.s32.totalorder %s2246_s14, %s2239_s24 }
  0x6e   : > { %p2243_p7 = pneg %p2242_p3  ;;  %p2249_p2 = por %p2248_p1, %p2247_p12 }
  0x70   : > { %p2250_p4 = pnand %p2249_p2, %p2243_p7 }
  0x72   : > { %2253 = shalt.err (!%p2250_p4)
}
  0x73   : > { %2087 = dma.hbm_to_vmem [thread:$0]  (!%p2550_p11), %s2548_s17, 512, %s2554_s18, %s2556_s16, %s2333_s19, %s2333_s19, %s2334_s21  }
  0x74   : > { %p2719_p9 = scmp.ne.s32.totalorder %s2713_s13, 0 }
  0x75   : > { %s2590_s12 = sand.u32 (!%p2719_p9), 1, %s2320_s28   ;;  %p2720_p0 = scmp.ne.s32.totalorder (!%p2719_p9), %s2710_s11, 0 }
  0x76   : > { %327 = sbr.rel (%p2719_p9) target bundleno = 1169 (0x491), region = 52  ;;  %s1414_s10 = sshll.u32 (!%p2719_p9), %s2590_s12, 5 }
  0x77   : > { %s330_s15 = scalar_lea.sflag (!%p2719_p9), [#allocation4], %s2590_s12  ;;  %s2596_s27 = scalar_lea.vmem (!%p2719_p9), [#allocation3], %s1414_s10 }
  0x7d   : > { %2299 = dma.done.wait (%p2720_p0), %s330_s15, 512  }
  0x7e   : > { %2301 = vsyncadd (%p2720_p0), %s330_s15, 4294966784  ;;  %p2721_p11 = scmp.eq.s32.totalorder %s2406_s9, 0 }
  0x80   : > { %2303 = dma.done.wait (%p2721_p11), [#allocation7], 7168   ;;  %p2722_p8 = pmov %p2721_p11 }
  0x82   : > { %2305 = vsyncadd (%p2722_p8), [#allocation7], 4294960128  ;;  %p2723_p13 = pmov %p2722_p8 }
  0x83   : > { %p2724_p6 = pmov %p2722_p8 }
  0x84   : > { %2307 = dma.done.wait (%p2723_p13), [#allocation10], 6144  }
  0x85   : > { %2309 = vsyncadd (%p2724_p6), [#allocation10], 4294961152  ;;  %p383_p10 = scmp.lt.s32.totalorder %s2406_s9, 1  ;;  %v392_v0 = vld [vmem:[#allocation6] sm:$0xff]  ;;  %v393_v1 = vld [vmem:[#allocation6 + $0x8] sm:$0xff]  ;;  %vm400_vm0 = vcmask 523264  }
  0x86   : > { %v394_v2 = vld [vmem:[#allocation6 + $0x10] sm:$0xff]  ;;  %v1830_v3 = vpack.c.bf16 %v393_v1, %v392_v0  ;;  %v395_v4 = vld [vmem:[#allocation6 + $0x18] sm:$0xff]  ;;  %v396_v6 = vld [vmem:[#allocation6 + $0x20] sm:$0xff]  ;;  %vm486_vm1 = vcmask 130048   ;;  %v2336_v48 = vmov 0.0   ;;  %s1436_s16 = sshll.u32 %s2406_s9, 9 }
  0x87   : > { %s384_s13 = scalar_select %p383_p10, %s2406_s9, 1  ;;  %v1834_v5 = vpack.c.bf16 %v395_v4, %v394_v2  ;;  %v397_v7 = vld [vmem:[#allocation6 + $0x28] sm:$0xff]  ;;  %v398_v10 = vld [vmem:[#allocation6 + $0x30] sm:$0xff]  ;;  %v399_v11 = vld [vmem:[#allocation6 + $0x38] sm:$0xff]  ;;  %388 = vst [vmem:[#allocation2] sm:$0x1] %v2336_v48 }
  0x88   : > { %1831 = vmatprep.subr.bf16.mxu0 %v1830_v3  ;;  %v1838_v9 = vpack.c.bf16 %v397_v7, %v396_v6  ;;  %v1842_v12 = vpack.c.bf16 %v399_v11, %v398_v10  ;;  %v482_v14 = vld [vmem:[%s2697_s2] sm:$0xff]  ;;  %v613_v15 = vld [vmem:[#allocation8 + $0x80] sm:$0xff]  ;;  %v614_v16 = vld [vmem:[#allocation8 + $0x88] sm:$0xff]  ;;  %389 = vst [vmem:[#allocation2 + $0x21] sm:$0x1] %v2336_v48  ;;  %s1277_s9 = scalar_lea.sflag [#allocation5], %s2590_s12 }
  0x89   : > { %s1435_s19 = sshll.u32 %s384_s13, 4  ;;  %1833 = vmatpush3.bf16.msra.mxu0 %v1830_v3  ;;  %1596 = vmatprep.mubr.msk.f32.mxu1 %vm486_vm1, %v482_v14  ;;  %v1850_v20 = vpack.c.bf16 %v614_v16, %v613_v15  ;;  %v615_v21 = vld [vmem:[#allocation8 + $0x90] sm:$0xff]  ;;  %v616_v22 = vld [vmem:[#allocation8 + $0x98] sm:$0xff]  ;;  %v483_v23 = vld [vmem:[%s2697_s2 + $0x8] sm:$0xff]  ;;  %s2337_s14 = smov [#allocation11]  }
  0x8a   : > { %s387_s17 = scalar_lea.vmem %s2695_s0, %s1435_s19  ;;  %1835 = vmatprep.subr.bf16.mxu0 %v1834_v5  ;;  %v484_v24 = vld [vmem:[%s2697_s2 + $0x10] sm:$0xff]  ;;  %v1854_v25 = vpack.c.bf16 %v616_v22, %v615_v21  ;;  %v617_v26 = vld [vmem:[#allocation8 + $0xa0] sm:$0xff]  ;;  %v485_v28 = vld [vmem:[%s2697_s2 + $0x18] sm:$0xff]  ;;  %s2258_s15 = sshll.u32 %s2337_s14, 4  ;;  %s2259_s15 = int_to_ptr.vmem [resolvable:$false] %s2258_s15 }
  0x8b   : > { %v390_v8 = vld [vmem:[%s387_s17] sm:$0xff]  ;;  %v391_v13 = vld [vmem:[%s387_s17 + $0x8] sm:$0xff]  ;;  %v618_v27 = vld [vmem:[#allocation8 + $0xa8] sm:$0xff]  ;;  %s382_s17 = scalar_lea.vmem [#allocation11], %s1414_s10  ;;  %s2651_s10 = scalar_lea.hbm %s2703_s8, %s1436_s16 }
  0x8c   : > { %1589 = vmatprep.mubr.msk.f32.mxu0 %vm400_vm0, %v390_v8  ;;  %v1858_v29 = vpack.c.bf16 %v618_v27, %v617_v26  ;;  %v619_v30 = vld [vmem:[#allocation8 + $0xb0] sm:$0xff]  ;;  %v620_v31 = vld [vmem:[#allocation8 + $0xb8] sm:$0xff]  ;;  %v621_v33 = vld [vmem:[#allocation8 + $0xc0] sm:$0xff]  ;;  %s1290_s18 = sshll.u32 %s382_s17, 4  ;;  %s2260_s13 = scalar_lea.vmem %s2259_s15, 1024  ;;  %s2646_s18 = int_to_ptr.vmem [resolvable:$true] %s1290_s18 }
  0x8d   : > { %1837 = vmatpush3.bf16.msra.mxu0 %v1834_v5  ;;  %v1862_v32 = vpack.c.bf16 %v620_v31, %v619_v30  ;;  %v622_v34 = vld [vmem:[#allocation8 + $0xc8] sm:$0xff]  ;;  %v623_v36 = vld [vmem:[#allocation8 + $0xd0] sm:$0xff]  ;;  %v624_v37 = vld [vmem:[#allocation8 + $0xd8] sm:$0xff]  ;;  %s2254_s20 = scalar_lea.vmem %s2646_s18, 512  ;;  %p2261_p1 = scmp.lt.s32.totalorder %s2646_s18, %s2259_s15 }
  0x8e   : > { %1839 = vmatprep.subr.bf16.mxu0 %v1838_v9  ;;  %v1866_v35 = vpack.c.bf16 %v622_v34, %v621_v33  ;;  %v1870_v38 = vpack.c.bf16 %v624_v37, %v623_v36  ;;  %v625_v39 = vld [vmem:[#allocation8 + $0xe0] sm:$0xff]  ;;  %v626_v40 = vld [vmem:[#allocation8 + $0xe8] sm:$0xff]  ;;  %v627_v42 = vld [vmem:[#allocation8 + $0xf0] sm:$0xff]  ;;  %p2255_p3 = scmp.ne.s32.totalorder %s2646_s18, %s2254_s20  ;;  %p2262_p2 = scmp.lt.s32.totalorder %s2260_s13, %s2254_s20 }
  0x8f   : > { %v1874_v41 = vpack.c.bf16 %v626_v40, %v625_v39  ;;  %v628_v43 = vld [vmem:[#allocation8 + $0xf8] sm:$0xff]  ;;  %v592_v45 = vld [vmem:[#allocation8] sm:$0xff]  ;;  %v593_v46 = vld [vmem:[#allocation8 + $0x8] sm:$0xff] }
  0x90   : > { %v1878_v44 = vpack.c.bf16 %v628_v43, %v627_v42  ;;  %v1882_v47 = vpack.c.bf16 %v593_v46, %v592_v45  ;;  %v961_v49 = vld [vmem:[#allocation9 + $0x80] sm:$0xff]  ;;  %v962_v50 = vld [vmem:[#allocation9 + $0x88] sm:$0xff]  ;;  %v963_v51 = vld [vmem:[#allocation9 + $0x90] sm:$0xff]  ;;  %p2256_p7 = pnand %p2255_p3, %p2539_p5  ;;  %p2263_p4 = por %p2262_p2, %p2261_p1 }
  0x91   : > { %1841 = vmatpush3.bf16.msra.mxu0 %v1838_v9  ;;  %v1946_v52 = vpack.c.bf16 %v962_v50, %v961_v49  ;;  %v964_v53 = vld [vmem:[#allocation9 + $0x98] sm:$0xff]  ;;  %v965_v55 = vld [vmem:[#allocation9 + $0xa0] sm:$0xff]  ;;  %v966_v56 = vld [vmem:[#allocation9 + $0xa8] sm:$0xff] }
  0x92   : > { %1843 = vmatprep.subr.bf16.mxu0 %v1842_v12  ;;  %v1950_v54 = vpack.c.bf16 %v964_v53, %v963_v51  ;;  %v1954_v57 = vpack.c.bf16 %v966_v56, %v965_v55  ;;  %v967_v58 = vld [vmem:[#allocation9 + $0xb0] sm:$0xff]  ;;  %v968_v59 = vld [vmem:[#allocation9 + $0xb8] sm:$0xff]  ;;  %v596_v2 = vld [vmem:[#allocation8 + $0x20] sm:$0xff]  ;;  %p2257_p12 = pneg %p2256_p7 }
  0x93   : > { %v1958_v60 = vpack.c.bf16 %v968_v59, %v967_v58  ;;  %v594_v61 = vld [vmem:[#allocation8 + $0x10] sm:$0xff]  ;;  %v595_v62 = vld [vmem:[#allocation8 + $0x18] sm:$0xff]  ;;  %v597_v3 = vld [vmem:[#allocation8 + $0x28] sm:$0xff] }
  0x94   : > { %v1886_v1 = vpack.c.bf16 %v595_v62, %v594_v61  ;;  %v1890_v6 = vpack.c.bf16 %v597_v3, %v596_v2  ;;  %v598_v7 = vld [vmem:[#allocation8 + $0x30] sm:$0xff]  ;;  %v599_v8 = vld [vmem:[#allocation8 + $0x38] sm:$0xff]  ;;  %v600_v11 = vld [vmem:[#allocation8 + $0x40] sm:$0xff]  ;;  %p2264_p9 = pnand %p2263_p4, %p2257_p12 }
  0x95   : > { %1845 = vmatpush3.bf16.msra.mxu0 %v1842_v12  ;;  %v1894_v10 = vpack.c.bf16 %v599_v8, %v598_v7  ;;  %v601_v12 = vld [vmem:[#allocation8 + $0x48] sm:$0xff]  ;;  %v602_v14 = vld [vmem:[#allocation8 + $0x50] sm:$0xff]  ;;  %v603_v15 = vld [vmem:[#allocation8 + $0x58] sm:$0xff] }
  0x96   : > { %1947 = vmatprep.subr.bf16.mxu0 %v1946_v52  ;;  %v1902_v16 = vpack.c.bf16 %v603_v15, %v602_v14  ;;  %v607_v21 = vld [vmem:[#allocation8 + $0x78] sm:$0xff]  ;;  %v806_v26 = vld [vmem:[#allocation8 + $0x110] sm:$0xff]  ;;  %v808_v30 = vld [vmem:[#allocation8 + $0x120] sm:$0xff] }
  0x97   : > { %v807_v27 = vld [vmem:[#allocation8 + $0x118] sm:$0xff]  ;;  %v809_v31 = vld [vmem:[#allocation8 + $0x128] sm:$0xff]  ;;  %v812_v39 = vld [vmem:[#allocation8 + $0x140] sm:$0xff] }
  0x98   : > { %1590 = vmatmul.mubr.msk.f32.vlgmr.msra.gmra.mrb[0].mxu0 %vm400_vm0, %v391_v13  ;;  %v1898_v13 = vpack.c.bf16 %v601_v12, %v600_v11  ;;  %v1922_v34 = vpack.c.bf16 %v809_v31, %v808_v30  ;;  %v811_v36 = vld [vmem:[#allocation8 + $0x138] sm:$0xff]  ;;  %v813_v40 = vld [vmem:[#allocation8 + $0x148] sm:$0xff]  ;;  %v814_v42 = vld [vmem:[#allocation8 + $0x150] sm:$0xff] }
  0x99   : > { %1949 = vmatpush3.bf16.msra.mxu0 %v1946_v52  ;;  %v815_v43 = vld [vmem:[#allocation8 + $0x158] sm:$0xff]  ;;  %v816_v45 = vld [vmem:[#allocation8 + $0x160] sm:$0xff]  ;;  %v817_v46 = vld [vmem:[#allocation8 + $0x168] sm:$0xff] }
  0x9a   : > { %1951 = vmatprep.subr.bf16.mxu0 %v1950_v54  ;;  %v818_v48 = vld [vmem:[#allocation8 + $0x170] sm:$0xff]  ;;  %v819_v49 = vld [vmem:[#allocation8 + $0x178] sm:$0xff]  ;;  %v970_v55 = vld [vmem:[#allocation9 + $0xc8] sm:$0xff] }
  0x9b   : > { %v1942_v50 = vpack.c.bf16 %v819_v49, %v818_v48  ;;  %v972_v58 = vld [vmem:[#allocation9 + $0xd8] sm:$0xff]  ;;  %v974_v61 = vld [vmem:[#allocation9 + $0xe8] sm:$0xff]  ;;  %v940_v2 = vld [vmem:[#allocation9] sm:$0xff] }
  0x9c   : > { %v941_v3 = vld [vmem:[#allocation9 + $0x8] sm:$0xff]  ;;  %v924_v12 = vld [vmem:[%s2596_s27] sm:$0xff]  ;;  %v942_v15 = vld [vmem:[#allocation9 + $0x10] sm:$0xff] }
  0x9d   : > { %1953 = vmatpush3.bf16.msra.mxu0 %v1950_v54  ;;  %v969_v54 = vld [vmem:[#allocation9 + $0xc0] sm:$0xff]  ;;  %v1153_v49 = vld [vmem:[#allocation9 + $0x108] sm:$0xff] }
  0x9e   : > { %1955 = vmatprep.subr.bf16.mxu0 %v1954_v57  ;;  %v1962_v56 = vpack.c.bf16 %v970_v55, %v969_v54  ;;  %v1152_v48 = vld [vmem:[#allocation9 + $0x100] sm:$0xff] }
  0x9f   : > { %v1156_v55 = vld [vmem:[#allocation9 + $0x120] sm:$0xff] }
  0xa1   : > { %1957 = vmatpush3.bf16.msra.mxu0 %v1954_v57  ;;  %v971_v57 = vld [vmem:[#allocation9 + $0xd0] sm:$0xff] }
  0xa2   : > { %1959 = vmatprep.subr.bf16.mxu0 %v1958_v60  ;;  %v1966_v59 = vpack.c.bf16 %v972_v58, %v971_v57 }
  0xa5   : > { %1961 = vmatpush3.bf16.msra.mxu0 %v1958_v60  ;;  %v973_v60 = vld [vmem:[#allocation9 + $0xe0] sm:$0xff] }
  0xa6   : > { %1963 = vmatprep.subr.bf16.mxu0 %v1962_v56  ;;  %v1970_v62 = vpack.c.bf16 %v974_v61, %v973_v60  ;;  %v1158_v60 = vld [vmem:[#allocation9 + $0x130] sm:$0xff]  ;;  %v1159_v61 = vld [vmem:[#allocation9 + $0x138] sm:$0xff] }
  0xa9   : > { %1965 = vmatpush3.bf16.msra.mxu0 %v1962_v56  ;;  %v1157_v56 = vld [vmem:[#allocation9 + $0x128] sm:$0xff] }
  0xaa   : > { %1967 = vmatprep.subr.bf16.mxu0 %v1966_v59  ;;  %v2018_v58 = vpack.c.bf16 %v1157_v56, %v1156_v55 }
  0xad   : > { %1969 = vmatpush3.bf16.msra.mxu0 %v1966_v59 }
  0xae   : > { %1971 = vmatprep.subr.bf16.mxu0 %v1970_v62 }
  0xb1   : > { %1973 = vmatpush3.bf16.msra.mxu0 %v1970_v62 }
 0x16b   : > { %v1591_v17 = vpop.f32.mrb[0].mxu0 }
 0x16c   : > { %v473_v18 = vpop.f32.mrb[1].mxu0 }
 0x16d   : > { %v1846_v19 = vpack.c.bf16 %v1591_v17, %v473_v18  ;;  %v604_v17 = vld [vmem:[#allocation8 + $0x60] sm:$0xff]  ;;  %v605_v18 = vld [vmem:[#allocation8 + $0x68] sm:$0xff] }
 0x16f   : > { %1847 = vmatprep.subr.bf16.mxu1 %v1846_v19 }
 0x170   : > { %1849 = vmatpush3.bf16.msra.mxu1 %v1846_v19  ;;  %v1906_v19 = vpack.c.bf16 %v605_v18, %v604_v17 }
 0x171   : > { %1851 = vmatprep.subr.bf16.mxu1 %v1850_v20 }
 0x173   : > { %1597 = vmatmul.mubr.msk.f32.vlgmr.msra.gmra.mrb[0].mxu1 %vm486_vm1, %v483_v23  ;;  %v804_v23 = vld [vmem:[#allocation8 + $0x100] sm:$0xff] }
 0x174   : > { %1599 = vmatprep.mubr.msk.f32.mxu1 %vm486_vm1, %v484_v24  ;;  %1853 = vmatpush3.bf16.msra.mxu1 %v1850_v20  ;;  %v606_v20 = vld [vmem:[#allocation8 + $0x70] sm:$0xff]  ;;  %v805_v24 = vld [vmem:[#allocation8 + $0x108] sm:$0xff] }
 0x175   : > { %1855 = vmatprep.subr.bf16.mxu1 %v1854_v25  ;;  %v1910_v22 = vpack.c.bf16 %v607_v21, %v606_v20  ;;  %v927_v21 = vld [vmem:[%s2596_s27 + $0x18] sm:$0xff] }
 0x177   : > { %1600 = vmatmul.mubr.msk.f32.gmra.mrb[2].mxu1 %vm486_vm1, %v485_v28  ;;  %v1918_v28 = vpack.c.bf16 %v807_v27, %v806_v26  ;;  %v944_v27 = vld [vmem:[#allocation9 + $0x20] sm:$0xff] }
 0x178   : > { %1857 = vmatpush3.bf16.msra.mxu1 %v1854_v25  ;;  %v1914_v25 = vpack.c.bf16 %v805_v24, %v804_v23  ;;  %v926_v24 = vld [vmem:[%s2596_s27 + $0x10] sm:$0xff] }
 0x179   : > { %1859 = vmatprep.subr.bf16.mxu1 %v1858_v29 }
 0x17c   : > { %1861 = vmatpush3.bf16.msra.mxu1 %v1858_v29 }
 0x17d   : > { %1863 = vmatprep.subr.bf16.mxu1 %v1862_v32 }
 0x180   : > { %1865 = vmatpush3.bf16.msra.mxu1 %v1862_v32 }
 0x181   : > { %1867 = vmatprep.subr.bf16.mxu1 %v1866_v35 }
 0x184   : > { %1869 = vmatpush3.bf16.msra.mxu1 %v1866_v35  ;;  %v810_v35 = vld [vmem:[#allocation8 + $0x130] sm:$0xff] }
 0x185   : > { %1871 = vmatprep.subr.bf16.mxu1 %v1870_v38 }
 0x188   : > { %1873 = vmatpush3.bf16.msra.mxu1 %v1870_v38  ;;  %v1926_v38 = vpack.c.bf16 %v811_v36, %v810_v35  ;;  %v948_v36 = vld [vmem:[#allocation9 + $0x40] sm:$0xff] }
 0x189   : > { %1875 = vmatprep.subr.bf16.mxu1 %v1874_v41 }
 0x18c   : > { %1877 = vmatpush3.bf16.msra.mxu1 %v1874_v41  ;;  %v1930_v41 = vpack.c.bf16 %v813_v40, %v812_v39  ;;  %v950_v39 = vld [vmem:[#allocation9 + $0x50] sm:$0xff]  ;;  %v951_v40 = vld [vmem:[#allocation9 + $0x58] sm:$0xff] }
 0x18d   : > { %1879 = vmatprep.subr.bf16.mxu1 %v1878_v44 }
 0x190   : > { %1881 = vmatpush3.bf16.msra.mxu1 %v1878_v44  ;;  %v1934_v44 = vpack.c.bf16 %v815_v43, %v814_v42  ;;  %v952_v42 = vld [vmem:[#allocation9 + $0x60] sm:$0xff]  ;;  %v953_v43 = vld [vmem:[#allocation9 + $0x68] sm:$0xff] }
 0x191   : > { %1883 = vmatprep.subr.bf16.mxu1 %v1882_v47 }
 0x246   : > { %v1598_v63 = vpop.f32.mrb[0].mxu1 }
 0x247   : > { %585 = vst [vmem:[#allocation2 + $0x9] sm:$0xff] %v1598_v63  ;;  %v565_v0 = vpop.f32.mrb[1].mxu1 }
 0x248   : > { %584 = vst [vmem:[#allocation2 + $0x1] sm:$0xff] %v565_v0  ;;  %1634 = vmatprep.mubr.f32.mxu1 %v565_v0  ;;  %v976_v0 = vld [vmem:[#allocation9 + $0xf8] sm:$0xff] }
 0x249   : > { %1635 = vmatmul.mubr.f32.vlgmr.msra.gmra.mrb[4].mxu1 %v1598_v63  ;;  %v975_v63 = vld [vmem:[#allocation9 + $0xf0] sm:$0xff] }
 0x24a   : > { %v1601_v4 = vpop.f32.mrb[2].mxu1  ;;  %1885 = vmatpush3.bf16.msra.mxu1 %v1882_v47  ;;  %v1938_v47 = vpack.c.bf16 %v817_v46, %v816_v45  ;;  %v954_v45 = vld [vmem:[#allocation9 + $0x70] sm:$0xff]  ;;  %v955_v46 = vld [vmem:[#allocation9 + $0x78] sm:$0xff] }
 0x24b   : > { %587 = vst [vmem:[#allocation2 + $0x19] sm:$0xff] %v1601_v4  ;;  %v575_v5 = vpop.f32.mrb[3].mxu1  ;;  %1887 = vmatprep.subr.bf16.mxu1 %v1886_v1 }
 0x24c   : > { %586 = vst [vmem:[#allocation2 + $0x11] sm:$0xff] %v575_v5  ;;  %1637 = vmatprep.mubr.f32.mxu1 %v575_v5  ;;  %v1427_v5 = vld [vmem:[%s2700_s5] ss:$0 sm:$0xff] }
 0x24d   : > { %1638 = vmatmul.mubr.f32.gmra.mrb[6].mxu1 %v1601_v4  ;;  %v1978_v4 = vpack.c.bf16 %v941_v3, %v940_v2  ;;  %v1162_v3 = vld [vmem:[#allocation9 + $0x150] sm:$0xff] }
 0x24e   : > { %1889 = vmatpush3.bf16.msra.mxu1 %v1886_v1  ;;  %v1974_v1 = vpack.c.bf16 %v976_v0, %v975_v63  ;;  %v2022_v63 = vpack.c.bf16 %v1159_v61, %v1158_v60  ;;  %v1160_v0 = vld [vmem:[#allocation9 + $0x140] sm:$0xff] }
 0x24f   : > { %v588_v9 = vld [vmem:[#allocation2] sm:$0xff]  ;;  %1891 = vmatprep.subr.bf16.mxu1 %v1890_v6  ;;  %v589_v29 = vld [vmem:[#allocation2 + $0x8] sm:$0xff] }
 0x250   : > { %1672 = vmatprep.mubr.f32.mxu1 %v588_v9  ;;  %v799_v37 = vld [vmem:[#allocation2 + $0x2] sm:$0xff]  ;;  %1975 = vmatprep.subr.bf16.mxu0 %v1974_v1  ;;  %v925_v9 = vld [vmem:[%s2596_s27 + $0x8] sm:$0xff] }
 0x251   : > { %1977 = vmatpush3.bf16.msra.mxu0 %v1974_v1  ;;  %v1161_v1 = vld [vmem:[#allocation9 + $0x148] sm:$0xff] }
 0x252   : > { %1893 = vmatpush3.bf16.msra.mxu1 %v1890_v6  ;;  %v802_v53 = vld [vmem:[#allocation2 + $0x1a] sm:$0xff]  ;;  %1979 = vmatprep.subr.bf16.mxu0 %v1978_v4  ;;  %v2026_v2 = vpack.c.bf16 %v1161_v1, %v1160_v0 }
 0x253   : > { %1895 = vmatprep.subr.bf16.mxu1 %v1894_v10  ;;  %v590_v32 = vld [vmem:[#allocation2 + $0x10] sm:$0xff]  ;;  %v591_v33 = vld [vmem:[#allocation2 + $0x18] sm:$0xff] }
 0x254   : > { %v800_v51 = vld [vmem:[#allocation2 + $0xa] sm:$0xff]  ;;  %v801_v52 = vld [vmem:[#allocation2 + $0x12] sm:$0xff] }
 0x256   : > { %1897 = vmatpush3.bf16.msra.mxu1 %v1894_v10 }
 0x257   : > { %1899 = vmatprep.subr.bf16.mxu1 %v1898_v13 }
 0x25a   : > { %1901 = vmatpush3.bf16.msra.mxu1 %v1898_v13 }
 0x25b   : > { %1903 = vmatprep.subr.bf16.mxu1 %v1902_v16 }
 0x25e   : > { %1905 = vmatpush3.bf16.msra.mxu1 %v1902_v16  ;;  %v943_v16 = vld [vmem:[#allocation9 + $0x18] sm:$0xff] }
 0x25f   : > { %1907 = vmatprep.subr.bf16.mxu1 %v1906_v19 }
 0x262   : > { %1909 = vmatpush3.bf16.msra.mxu1 %v1906_v19 }
 0x263   : > { %1911 = vmatprep.subr.bf16.mxu1 %v1910_v22 }
 0x266   : > { %1913 = vmatpush3.bf16.msra.mxu1 %v1910_v22 }
 0x267   : > { %1915 = vmatprep.subr.bf16.mxu1 %v1914_v25 }
 0x269   : > { %1673 = vmatmul.mubr.f32.vlgmr.msra.gmra.mrb[4].mxu1 %v589_v29 }
 0x26a   : > { %1675 = vmatprep.mubr.f32.mxu1 %v590_v32  ;;  %1917 = vmatpush3.bf16.msra.mxu1 %v1914_v25  ;;  %v1982_v25 = vpack.c.bf16 %v943_v16, %v942_v15  ;;  %v946_v32 = vld [vmem:[#allocation9 + $0x30] sm:$0xff]  ;;  %v1428_v15 = vld [vmem:[%s2702_s7] ss:$0 sm:$0xff] }
 0x26b   : > { %1919 = vmatprep.subr.bf16.mxu1 %v1918_v28 }
 0x26d   : > { %1676 = vmatmul.mubr.f32.gmra.mrb[6].mxu1 %v591_v33  ;;  %v947_v33 = vld [vmem:[#allocation9 + $0x38] sm:$0xff] }
 0x26e   : > { %1921 = vmatpush3.bf16.msra.mxu1 %v1918_v28  ;;  %1710 = vmatprep.mubr.f32.mxu1 %v799_v37  ;;  %v945_v28 = vld [vmem:[#allocation9 + $0x28] sm:$0xff]  ;;  %v1990_v35 = vpack.c.bf16 %v947_v33, %v946_v32 }
 0x26f   : > { %1923 = vmatprep.subr.bf16.mxu1 %v1922_v34  ;;  %v1986_v31 = vpack.c.bf16 %v945_v28, %v944_v27  ;;  %v949_v37 = vld [vmem:[#allocation9 + $0x48] sm:$0xff] }
 0x272   : > { %1925 = vmatpush3.bf16.msra.mxu1 %v1922_v34 }
 0x273   : > { %1927 = vmatprep.subr.bf16.mxu1 %v1926_v38 }
 0x276   : > { %1929 = vmatpush3.bf16.msra.mxu1 %v1926_v38  ;;  %v1994_v38 = vpack.c.bf16 %v949_v37, %v948_v36 }
 0x277   : > { %1931 = vmatprep.subr.bf16.mxu1 %v1930_v41 }
 0x27a   : > { %1933 = vmatpush3.bf16.msra.mxu1 %v1930_v41  ;;  %v1998_v41 = vpack.c.bf16 %v951_v40, %v950_v39 }
 0x27b   : > { %1935 = vmatprep.subr.bf16.mxu1 %v1934_v44 }
 0x27e   : > { %1937 = vmatpush3.bf16.msra.mxu1 %v1934_v44  ;;  %v2002_v44 = vpack.c.bf16 %v953_v43, %v952_v42 }
 0x27f   : > { %1939 = vmatprep.subr.bf16.mxu1 %v1938_v47 }
 0x282   : > { %1941 = vmatpush3.bf16.msra.mxu1 %v1938_v47  ;;  %v2006_v47 = vpack.c.bf16 %v955_v46, %v954_v45 }
 0x283   : > { %1943 = vmatprep.subr.bf16.mxu1 %v1942_v50 }
 0x286   : > { %1945 = vmatpush3.bf16.msra.mxu1 %v1942_v50  ;;  %v2010_v50 = vpack.c.bf16 %v1153_v49, %v1152_v48 }
 0x289   : > { %1711 = vmatmul.mubr.f32.vlgmr.msra.gmra.mrb[4].mxu1 %v800_v51  ;;  %v1154_v51 = vld [vmem:[#allocation9 + $0x110] sm:$0xff] }
 0x28a   : > { %1713 = vmatprep.mubr.f32.mxu1 %v801_v52  ;;  %v1155_v52 = vld [vmem:[#allocation9 + $0x118] sm:$0xff] }
 0x28d   : > { %1714 = vmatmul.mubr.f32.gmra.mrb[6].mxu1 %v802_v53  ;;  %v2014_v53 = vpack.c.bf16 %v1155_v52, %v1154_v51 }
 0x35c   : > { %v1712_v6 = vpop.f32.mrb[4].mxu1 }
 0x35d   : > { %v917_v7 = vadd.f32 %v1712_v6, %v1427_v5  ;;  %v886_v8 = vpop.f32.mrb[5].mxu1  ;;  %v1164_v6 = vld [vmem:[#allocation9 + $0x160] sm:$0xff] }
 0x35e   : > { %v916_v10 = vadd.f32 %v1427_v5, %v886_v8 }
 0x35f   : > { %v921_v11 = vmax.f32 %v917_v7, 0.0  ;;  %v1165_v7 = vld [vmem:[#allocation9 + $0x168] sm:$0xff] }
 0x360   : > { %v920_v13 = vmax.f32 %v916_v10, 0.0  ;;  %v1715_v14 = vpop.f32.mrb[6].mxu1  ;;  %v2034_v8 = vpack.c.bf16 %v1165_v7, %v1164_v6  ;;  %v1167_v10 = vld [vmem:[#allocation9 + $0x178] sm:$0xff] }
 0x361   : > { %v929_v17 = vadd.f32 %v925_v9, %v921_v11  ;;  %v919_v18 = vadd.f32 %v1715_v14, %v1427_v5  ;;  %v896_v19 = vpop.f32.mrb[7].mxu1  ;;  %v1166_v9 = vld [vmem:[#allocation9 + $0x170] sm:$0xff] }
 0x362   : > { %v928_v20 = vadd.f32 %v924_v12, %v920_v13  ;;  %v918_v22 = vadd.f32 %v1427_v5, %v896_v19  ;;  %v2038_v11 = vpack.c.bf16 %v1167_v10, %v1166_v9 }
 0x363   : > { %933 = vst [vmem:[#allocation2 + $0x9] sm:$0xff] %v929_v17  ;;  %v923_v23 = vmax.f32 %v919_v18, 0.0 }
 0x364   : > { %932 = vst [vmem:[#allocation2 + $0x1] sm:$0xff] %v928_v20  ;;  %v922_v26 = vmax.f32 %v918_v22, 0.0  ;;  %1748 = vmatprep.mubr.f32.mxu0 %v928_v20 }
 0x365   : > { %v931_v29 = vadd.f32 %v927_v21, %v923_v23  ;;  %1749 = vmatmul.mubr.f32.vlgmr.msra.gmra.mrb[2].mxu0 %v929_v17 }
 0x366   : > { %v930_v30 = vadd.f32 %v926_v24, %v922_v26  ;;  %1981 = vmatpush3.bf16.msra.mxu0 %v1978_v4  ;;  %v1163_v4 = vld [vmem:[#allocation9 + $0x158] sm:$0xff] }
 0x367   : > { %935 = vst [vmem:[#allocation2 + $0x19] sm:$0xff] %v931_v29  ;;  %1983 = vmatprep.subr.bf16.mxu0 %v1982_v25  ;;  %v2030_v5 = vpack.c.bf16 %v1163_v4, %v1162_v3 }
 0x368   : > { %934 = vst [vmem:[#allocation2 + $0x11] sm:$0xff] %v930_v30  ;;  %1751 = vmatprep.mubr.f32.mxu0 %v930_v30 }
 0x369   : > { %1752 = vmatmul.mubr.f32.gmra.mrb[4].mxu0 %v931_v29 }
 0x36a   : > { %1985 = vmatpush3.bf16.msra.mxu0 %v1982_v25 }
 0x36b   : > { %v936_v34 = vld [vmem:[#allocation2] sm:$0xff]  ;;  %1987 = vmatprep.subr.bf16.mxu0 %v1986_v31  ;;  %v937_v54 = vld [vmem:[#allocation2 + $0x8] sm:$0xff] }
 0x36c   : > { %1786 = vmatprep.mubr.f32.mxu0 %v936_v34  ;;  %v1147_v62 = vld [vmem:[#allocation2 + $0x2] sm:$0xff] }
 0x36e   : > { %1989 = vmatpush3.bf16.msra.mxu0 %v1986_v31  ;;  %v1150_v14 = vld [vmem:[#allocation2 + $0x1a] sm:$0xff] }
 0x36f   : > { %1991 = vmatprep.subr.bf16.mxu0 %v1990_v35  ;;  %v938_v57 = vld [vmem:[#allocation2 + $0x10] sm:$0xff]  ;;  %v939_v59 = vld [vmem:[#allocation2 + $0x18] sm:$0xff] }
 0x370   : > { %v1148_v12 = vld [vmem:[#allocation2 + $0xa] sm:$0xff]  ;;  %v1149_v13 = vld [vmem:[#allocation2 + $0x12] sm:$0xff] }
 0x372   : > { %1993 = vmatpush3.bf16.msra.mxu0 %v1990_v35 }
 0x373   : > { %1995 = vmatprep.subr.bf16.mxu0 %v1994_v38 }
 0x376   : > { %1997 = vmatpush3.bf16.msra.mxu0 %v1994_v38 }
 0x377   : > { %1999 = vmatprep.subr.bf16.mxu0 %v1998_v41 }
 0x37a   : > { %2001 = vmatpush3.bf16.msra.mxu0 %v1998_v41 }
 0x37b   : > { %2003 = vmatprep.subr.bf16.mxu0 %v2002_v44 }
 0x37e   : > { %2005 = vmatpush3.bf16.msra.mxu0 %v2002_v44 }
 0x37f   : > { %2007 = vmatprep.subr.bf16.mxu0 %v2006_v47 }
 0x382   : > { %2009 = vmatpush3.bf16.msra.mxu0 %v2006_v47 }
 0x383   : > { %2011 = vmatprep.subr.bf16.mxu0 %v2010_v50 }
 0x385   : > { %1787 = vmatmul.mubr.f32.vlgmr.msra.gmra.mrb[2].mxu0 %v937_v54 }
 0x386   : > { %1789 = vmatprep.mubr.f32.mxu0 %v938_v57  ;;  %2013 = vmatpush3.bf16.msra.mxu0 %v2010_v50 }
 0x387   : > { %2015 = vmatprep.subr.bf16.mxu0 %v2014_v53 }
 0x389   : > { %1790 = vmatmul.mubr.f32.gmra.mrb[4].mxu0 %v939_v59 }
 0x38a   : > { %2017 = vmatpush3.bf16.msra.mxu0 %v2014_v53  ;;  %1824 = vmatprep.mubr.f32.mxu0 %v1147_v62 }
 0x38b   : > { %2019 = vmatprep.subr.bf16.mxu0 %v2018_v58 }
 0x38e   : > { %2021 = vmatpush3.bf16.msra.mxu0 %v2018_v58 }
 0x38f   : > { %2023 = vmatprep.subr.bf16.mxu0 %v2022_v63 }
 0x392   : > { %2025 = vmatpush3.bf16.msra.mxu0 %v2022_v63 }
 0x393   : > { %2027 = vmatprep.subr.bf16.mxu0 %v2026_v2 }
 0x396   : > { %2029 = vmatpush3.bf16.msra.mxu0 %v2026_v2 }
 0x397   : > { %2031 = vmatprep.subr.bf16.mxu0 %v2030_v5 }
 0x39a   : > { %2033 = vmatpush3.bf16.msra.mxu0 %v2030_v5 }
 0x39b   : > { %2035 = vmatprep.subr.bf16.mxu0 %v2034_v8 }
 0x39e   : > { %2037 = vmatpush3.bf16.msra.mxu0 %v2034_v8 }
 0x39f   : > { %2039 = vmatprep.subr.bf16.mxu0 %v2038_v11 }
 0x3a2   : > { %2041 = vmatpush3.bf16.msra.mxu0 %v2038_v11 }
 0x3a5   : > { %1825 = vmatmul.mubr.f32.vlgmr.msra.gmra.mrb[2].mxu0 %v1148_v12 }
 0x3a6   : > { %1827 = vmatprep.mubr.f32.mxu0 %v1149_v13 }
 0x3a9   : > { %1828 = vmatmul.mubr.f32.gmra.mrb[4].mxu0 %v1150_v14 }
 0x478   : > { %v1826_v16 = vpop.f32.mrb[2].mxu0 }
 0x479   : > { %v1265_v17 = vadd.f32 %v1826_v16, %v1428_v15  ;;  %v1234_v18 = vpop.f32.mrb[3].mxu0 }
 0x47a   : > { %v1264_v19 = vadd.f32 %v1428_v15, %v1234_v18 }
 0x47b   : > { %v1269_v20 = vmax.f32 %v1265_v17, 0.0 }
 0x47c   : > { %v1268_v21 = vmax.f32 %v1264_v19, 0.0  ;;  %v1829_v22 = vpop.f32.mrb[4].mxu0 }
 0x47d   : > { %1273 = vst [vmem:[%s382_s17 + $0x8] sm:$0xff] %v1269_v20  ;;  %v1267_v23 = vadd.f32 %v1829_v22, %v1428_v15  ;;  %v1244_v24 = vpop.f32.mrb[5].mxu0 }
 0x47e   : > { %1272 = vst [vmem:[%s382_s17] sm:$0xff] %v1268_v21  ;;  %v1266_v25 = vadd.f32 %v1428_v15, %v1244_v24 }
 0x47f   : > { %v1271_v26 = vmax.f32 %v1267_v23, 0.0 }
 0x480   : > { %v1270_v27 = vmax.f32 %v1266_v25, 0.0 }
 0x481   : > { %1275 = vst [vmem:[%s382_s17 + $0x18] sm:$0xff] %v1271_v26 }
 0x482   : > { %1274 = vst [vmem:[%s382_s17 + $0x10] sm:$0xff] %v1270_v27 }
 0x483   : > { %2267 = shalt.err (!%p2264_p9)
}
 0x484   : > { %s2268_s19 = scalar_lea.hbm %s2651_s10, 512  ;;  %s2272_s11 = scalar_lea.hbm %s2703_s8, 1024 }
 0x485   : > { %p2269_p0 = scmp.ne.s32.totalorder %s2651_s10, %s2268_s19  ;;  %p2273_p13 = scmp.lt.u32.totalorder %s2651_s10, %s2703_s8 }
 0x486   : > { %p2274_p6 = scmp.lt.u32.totalorder %s2272_s11, %s2268_s19  ;;  %p2276_p3 = scmp.lt.u32.totalorder %s2268_s19, %s2651_s10 }
 0x487   : > { %p2270_p11 = pnand %p2269_p0, %p2539_p5 }
 0x488   : > { %p2275_p10 = por %p2274_p6, %p2273_p13 }
 0x489   : > { %p2271_p8 = pneg %p2270_p11 }
 0x48a   : > { %p2277_p7 = por %p2276_p3, %p2275_p10 }
 0x48c   : > { %p2278_p12 = pnand %p2277_p7, %p2271_p8 }
 0x48e   : > { %2281 = shalt.err (!%p2278_p12)
}
 0x48f   : > { %s2338_s24 = smov 128   ;;  %s2339_s25 = smov 8  }
 0x490   : > { %2072 = dma.vmem_to_hbm [thread:$0]  (%p2539_p5), %s2646_s18, 512, %s2651_s10, %s1277_s9, %s2338_s24, %s2338_s24, %s2339_s25  }
 0x491 PF: > { %s2725_s20 = sld [smem:[#allocation16_spill]]  ;;  %s2726_s14 = sld [smem:[#allocation17_spill]] }
 0x492   : > { %p2728_p2 = scmp.ge.s32.totalorder %s2328_s30, 2 }
 0x497   : > { %s1305_s15 = sand.u32 1, %s2725_s20   ;;  %p2727_p1 = scmp.ne.s32.totalorder %s2726_s14, 0 }
 0x498   : > { %s1306_s13 = scalar_lea.sflag [#allocation5], %s1305_s15 }
 0x499   : > { %p2089_p4 = pnand %p2728_p2, %p2727_p1 }
 0x49b   : > { %2311 = dma.done.wait (!%p2089_p4), %s1306_s13, 512  }
 0x49c   : > { %2313 = vsyncadd (!%p2089_p4), %s1306_s13, 4294966784  ;;  %p23_p9 = scmp.ge.s32.totalorder %s2525_s26, 4   ;;  %s2729_s27 = smov %s2320_s28 }
 0x49d   : > { %s2730_s28 = smov %s2324_s29  ;;  %s2731_s29 = smov %s2535_s22 }
 0x49e   : > { %s2732_s30 = smov %s2525_s26  ;;  %25 = sbr.rel (!%p23_p9) target bundleno = 7 (0x7), region = 116 }
 0x4a5   :  { %1311 = vsyncpa [#allocation4], 1 }
 0x4a6   :  { %1313 = vsyncpa [#allocation4 + $0x1], 1 }
 0x4a7   :  { %1314 = vsyncpa [#allocation7], 1 }
 0x4a8   :  { %1315 = vsyncpa [#allocation10], 1 }
 0x4a9   :  { %1316 = vsyncpa [#allocation5], 1 }
 0x4aa   :  { %1318 = vsyncpa [#allocation5 + $0x1], 1 }

</bundles_post_ra>
